<compile_context>
chip_gen: v5e
topology: v5e:2x2
jax: 0.10.0
libtpu: 0.0.40
codegen_flags: <defaults>
</compile_context>

<pallas_src>
import jax
import jax.numpy as jnp
from jax.experimental import pallas as pl
from jax.experimental.pallas import tpu as pltpu


# ----------------------------------------------------------------------------
# helpers
# ----------------------------------------------------------------------------
def _vmem_limit_bytes():
    cap = 64 << 20                           # conservative default (v7x per-TC)
    try:
        info = pltpu.get_tpu_info()
        cap = int(getattr(info, "vmem_capacity_bytes", cap) or cap)
    except Exception:
        pass
    # ~55% of physical capacity, clamped to a sane range.
    return int(min(max((cap * 11) // 20, 16 << 20), 112 << 20))


def _sublane_multiple(dtype):
    # minimum second-minor tile: 8 for 32-bit, 16 for 16-bit, 32 for 8-bit
    return max(8, 32 // jnp.dtype(dtype).itemsize)


def _round_up(v, m):
    return ((v + m - 1) // m) * m


def _pick_block_rows(total_rows, bytes_per_row_pipelined, sub, vmem_limit,
                     target_steps=8):
    """Rows per grid step: aim for ~target_steps steps, sublane aligned,
    capped by the VMEM budget.  Full-dim block when that covers everything."""
    budget = max(vmem_limit - (2 << 20), bytes_per_row_pipelined * sub)
    cap = max(sub, (budget // bytes_per_row_pipelined) // sub * sub)
    br = _round_up(max(1, -(-total_rows // target_steps)), sub)
    br = min(br, cap)
    if br >= total_rows:
        br = total_rows                      # full-dim block is always legal
    return br


# ----------------------------------------------------------------------------
# D == 12 fast path: lane-dense stride-4 gather via one-hot MXU matmul
# ----------------------------------------------------------------------------
def _dense_kernel(x_ref, sel_ref, o_ref):
    # (br, 512) @ (512, 128) one-hot -> (br, 128): exact stride-4 lane gather.
    o_ref[...] = jnp.dot(
        x_ref[...], sel_ref[...],
        preferred_element_type=jnp.float32,
        precision=jax.lax.Precision.HIGHEST,
    ).astype(o_ref.dtype)


def _informed_encoder_dense(x):
    B, D = x.shape                           # D == 12, B % 128 == 0
    dt = x.dtype
    itemsize = jnp.dtype(dt).itemsize
    R = (B * D) // 512                       # = 3 * B / 128 (exact)

    xv = x.reshape(R, 512)                   # free row-major view
    # One-hot selection matrix: sel[p, m] = 1 iff p == 4*m.
    sel = (jnp.arange(512, dtype=jnp.int32)[:, None]
           == 4 * jnp.arange(128, dtype=jnp.int32)[None, :]).astype(dt)

    vmem_limit = _vmem_limit_bytes()
    sub = _sublane_multiple(dt)
    per_row = 2 * (512 + 128) * itemsize     # in + out lanes, double-buffered
    sel_bytes = 2 * 512 * 128 * itemsize     # resident one-hot (double buffer)
    br = _pick_block_rows(R, per_row, sub, vmem_limit - sel_bytes)
    grid = (pl.cdiv(R, br),)

    out = pl.pallas_call(
        _dense_kernel,
        out_shape=jax.ShapeDtypeStruct((R, 128), dt),
        grid=grid,
        in_specs=[
            pl.BlockSpec((br, 512), lambda i: (i, 0)),
            pl.BlockSpec((512, 128), lambda i: (0, 0)),   # constant block
        ],
        out_specs=pl.BlockSpec((br, 128), lambda i: (i, 0)),
        compiler_params=pltpu.CompilerParams(
            dimension_semantics=("parallel",),
            vmem_limit_bytes=vmem_limit,
        ),
    )(xv, sel)
    return out.reshape(B, 3)                 # free row-major reshape (R*128 = 3B)


# ----------------------------------------------------------------------------
# generic fallback: direct column gather (any D >= 9, any B)
# ----------------------------------------------------------------------------
def _generic_kernel(x_ref, o_ref):
    x = x_ref[...]
    o_ref[:, 0:1] = x[:, 0:1]
    o_ref[:, 1:2] = x[:, 4:5]
    o_ref[:, 2:3] = x[:, 8:9]


def _informed_encoder_generic(x):
    B, D = x.shape
    dt = x.dtype
    itemsize = jnp.dtype(dt).itemsize

    # Columns 0/4/8 live in the first 128 lanes; don't read more than needed.
    in_cols = D if D <= 128 else 128

    vmem_limit = _vmem_limit_bytes()
    sub = _sublane_multiple(dt)
    per_row = 2 * (_round_up(in_cols, 128) + 128) * itemsize   # lane-padded
    br = _pick_block_rows(B, per_row, sub, vmem_limit)
    grid = (pl.cdiv(B, br),)

    return pl.pallas_call(
        _generic_kernel,
        out_shape=jax.ShapeDtypeStruct((B, 3), dt),
        grid=grid,
        in_specs=[pl.BlockSpec((br, in_cols), lambda i: (i, 0))],
        out_specs=pl.BlockSpec((br, 3), lambda i: (i, 0)),
        compiler_params=pltpu.CompilerParams(
            dimension_semantics=("parallel",),
            vmem_limit_bytes=vmem_limit,
        ),
    )(x)


def informed_encoder(x):
    """Pallas equivalent of InformedEncoder.forward; x: (B, D), D >= 9."""
    assert x.ndim == 2, "expected (batch, observable_dim)"
    B, D = x.shape
    assert D >= 9, "observable_dim must be >= 9 (needs columns 0, 4, 8)"
    # Stride-4 lane-dense fast path is only valid when D == 12 exactly and the
    # flattened array reshapes evenly to 512-wide rows (B % 128 == 0).
    if D == 12 and B > 0 and B % 128 == 0:
        return _informed_encoder_dense(x)
    return _informed_encoder_generic(x)


# ----------------------------------------------------------------------------
# tests
# ----------------------------------------------------------------------------
def _reference(x):
    return jnp.stack([x[:, 0], x[:, 4], x[:, 8]], axis=1)


def _check(x, rtol=0.0, atol=0.0):
    out = informed_encoder(x)
    jax.block_until_ready(out)
    ref = _reference(x)
    assert out.shape == ref.shape and out.dtype == ref.dtype
    assert jnp.allclose(out, ref, rtol=rtol, atol=atol), "mismatch vs reference"


if __name__ == "__main__":
    key = jax.random.PRNGKey(0)
    k0, k1, k2, k3 = jax.random.split(key, 4)

    # Small shape consistent with the module (observable_dim=12): generic path.
    _check(jax.random.normal(k0, (8, 12), dtype=jnp.float32))

    # Generic path: multi-step grid with a ragged last row-tile (100 = 6*16+4).
    _check(jax.random.normal(k1, (100, 12), dtype=jnp.float32))

    # Dense MXU path: B % 128 == 0, multi-step grid, ragged last tile of the
    # (R, 512) view (R = 174 not a multiple of the 24-row block).
    _check(jax.random.normal(k2, (7424, 12), dtype=jnp.float32), atol=1e-5)

    # Non-default observable_dim: must take the generic column-gather fallback.
    _check(jax.random.normal(k3, (40, 16), dtype=jnp.float32))

    print("KERNEL_OK")
</pallas_src>

<mosaic_0001>
module attributes {stable_mosaic.version = 11 : i64} {
  func.func @_generic_kernel(%arg0: i32, %arg1: memref<8x12xf32, #tpu.memory_space<vmem>>, %arg2: memref<8x3xf32, #tpu.memory_space<vmem>>) attributes {dimension_semantics = [#tpu.dimension_semantics<parallel>], iteration_bounds = array<i64: 1>, scalar_prefetch = 0 : i64, scratch_operands = 0 : i64, tpu.core_type = #tpu.core_type<tc>, window_params = [{transform_indices = @transform_0, window_bounds = array<i64: 8, 12>}, {transform_indices = @transform_1, window_bounds = array<i64: 8, 3>}]} {
    %c0 = arith.constant 0 : index
    %c0_0 = arith.constant 0 : index
    %0 = vector.load %arg1[%c0, %c0_0] : memref<8x12xf32, #tpu.memory_space<vmem>>, vector<8x12xf32>
    %1 = vector.extract_strided_slice %0 {offsets = [0, 0], sizes = [8, 1], strides = [1, 1]} : vector<8x12xf32> to vector<8x1xf32>
    %c0_1 = arith.constant 0 : index
    %c0_2 = arith.constant 0 : index
    %2 = vector.load %arg2[%c0_1, %c0_2] : memref<8x3xf32, #tpu.memory_space<vmem>>, vector<8x1xf32>
    tpu.vector_store %arg2[%c0_1, %c0_2], %1 {strides = array<i32>} : memref<8x3xf32, #tpu.memory_space<vmem>>, vector<8x1xf32>,
    %3 = vector.extract_strided_slice %0 {offsets = [0, 4], sizes = [8, 1], strides = [1, 1]} : vector<8x12xf32> to vector<8x1xf32>
    %c0_3 = arith.constant 0 : index
    %c1 = arith.constant 1 : index
    %4 = vector.load %arg2[%c0_3, %c1] : memref<8x3xf32, #tpu.memory_space<vmem>>, vector<8x1xf32>
    tpu.vector_store %arg2[%c0_3, %c1], %3 {strides = array<i32>} : memref<8x3xf32, #tpu.memory_space<vmem>>, vector<8x1xf32>,
    %5 = vector.extract_strided_slice %0 {offsets = [0, 8], sizes = [8, 1], strides = [1, 1]} : vector<8x12xf32> to vector<8x1xf32>
    %c0_4 = arith.constant 0 : index
    %c2 = arith.constant 2 : index
    %6 = vector.load %arg2[%c0_4, %c2] : memref<8x3xf32, #tpu.memory_space<vmem>>, vector<8x1xf32>
    tpu.vector_store %arg2[%c0_4, %c2], %5 {strides = array<i32>} : memref<8x3xf32, #tpu.memory_space<vmem>>, vector<8x1xf32>,
    return
  }
  func.func @transform_0(%arg0: i32) -> (i32, i32) {
    %c0_i32 = arith.constant 0 : i32
    %c0_i32_0 = arith.constant 0 : i32
    return %arg0, %c0_i32 : i32, i32
  }
  func.func @transform_1(%arg0: i32) -> (i32, i32) {
    %c0_i32 = arith.constant 0 : i32
    %c0_i32_0 = arith.constant 0 : i32
    return %arg0, %c0_i32 : i32, i32
  }
}

</mosaic_0001>

<bundles_post_ra>
// kernel: tpu_custom_call.1
= control target key start
LH: loop header
LB: loop body
LE: loop exit
PB: predicated region body
PF: predicated region fallthrough
CT: control target
= control target key end

     0   :  { %6 = vsyncpa [#allocation3], 0  ;;  %s70_s9 = smov [#allocation2]   ;;  %s95_s0 = inlined_call_operand.hbm [shape: f32[8,12], index: 0, kind: input, shape index: {}]   ;;  %s96_s1 = inlined_call_operand.vmem [shape: f32[8,3], index: 1, kind: output, shape index: {}]  }
   0x1   :  { %s12_s8 = sshll.u32 %s95_s0, 4  ;;  %s14_s10 = sshll.u32 %s70_s9, 4  ;;  %s13_s8 = int_to_ptr.hbm [resolvable:$true] %s12_s8  ;;  %s15_s10 = int_to_ptr.vmem [resolvable:$true] %s14_s10 }
   0x2   :  { %17 = dma.hbm_to_vmem [thread:$0]  %s13_s8, 128, %s15_s10, [#allocation3]  }
   0x3   :  { %68 = dma.done.wait [#allocation3], 128  }
   0x4   :  { %69 = vsyncadd [#allocation3], 4294967168  ;;  %vm23_vm0 = vcmask 7168   ;;  %v22_v0 = vld [vmem:[#allocation2] sm:$0xff]  ;;  %s71_s11 = smov 125   ;;  %s72_s14 = smov 122  }
   0x5   :  { %26 = vrot.lane.b32.xlu0 %v22_v0, %s71_s11  ;;  %24 = vst.msk [vmem:[%s96_s1] sm:$0xff] %vm23_vm0, %v22_v0  ;;  %vm29_vm1 = vcmask 15368   ;;  %vm34_vm2 = vcmask 23568  }
   0xd   :  { %31 = vrot.lane.b32.xlu0 %v22_v0, %s72_s14 }
  0x77   :  { %v27_v1 = vpop.permute.xlu0 %26 }
  0x78   :  { %30 = vst.msk [vmem:[%s96_s1] sm:$0xff] %vm29_vm1, %v27_v1 }
  0x7f   :  { %v32_v2 = vpop.permute.xlu0 %31 }
  0x80   :  { %35 = vst.msk [vmem:[%s96_s1] sm:$0xff] %vm34_vm2, %v32_v2 }
  0x81   :  { %40 = vsyncpa [#allocation3], 1 }

</bundles_post_ra>
